<compile_context>
chip_gen: v5e
topology: v5e:2x2
jax: 0.10.0
libtpu: 0.0.40
codegen_flags: <defaults>
</compile_context>

<pallas_src>
import jax
import jax.numpy as jnp
from jax.experimental import pallas as pl
from jax.experimental.pallas import tpu as pltpu


def _snn_head_kernel(x_ref, w_ref, b_ref, o_ref):
    # x_ref: (Mt, 64, 384)   w_ref: (384, 3) = fc_w.T / 64   b_ref: (1, 3)   o_ref: (Mt, 3)
    x = x_ref[...].astype(jnp.float32)
    feat = jnp.sum(x, axis=1)                                            # (Mt, 384) group sums
    y = jnp.dot(feat, w_ref[...], preferred_element_type=jnp.float32)   # single K=384 MXU dot
    o_ref[...] = (y + b_ref[...]).astype(o_ref.dtype)


def _choose_row_tile(bt):
    """Rows (b,t pairs) per grid step.

    Cap at 64: double-buffered x tile = 2*64*64*384*4 B = 12.6 MiB (f32), well inside the
    32 MiB scoped-VMEM budget on every generation.  Prefer >= 2 grid steps (megacore) and a
    tile that divides BT exactly (no padded rows) when one exists.
    """
    cap = 64
    if bt <= 8:
        return bt                                  # single tile; Mt == full dim is legal
    half = (bt // 2) // 8 * 8                      # largest multiple of 8 <= bt/2
    mt = min(cap, half) if half >= 8 else min(cap, bt)
    if mt % 8 == 0:
        for cand in range(mt, 7, -8):              # prefer an exact divisor of bt nearby
            if bt % cand == 0:
                return cand
    return mt


def snn_head_forward(out_from_net, fc_w, fc_b, num_steps):
    """out_from_net: [B, 256, H', W', T]; fc_w: [3, 384]; fc_b: [3] -> [B, T, 3]."""
    B, C, Hp, Wp, T = out_from_net.shape
    n_out, n_in = fc_w.shape
    P = Hp * Wp
    assert C == 256 and T == num_steps and 4 * P == n_in

    # Single layout transform (paid exactly once): [B,256,H',W',T] -> [B*T, 64, 4*P]
    #   element (b*T+t, c, g*P + p) == out_from_net[b, g*64+c, h, w, t],  p = h*Wp + w
    # which matches torch's narrow/sum/cat/reshape feature ordering.
    x = out_from_net.reshape(B, 4, 64, P, T)
    x = jnp.transpose(x, (0, 4, 2, 1, 3)).reshape(B * T, 64, 4 * P)

    # Fold the 1/64 group-mean scale into the (384, 3) weight once (tiny, constant-foldable).
    w_t = (jnp.transpose(fc_w).astype(jnp.float32)) * (1.0 / 64.0)   # (384, 3)
    bias = fc_b.reshape(1, n_out).astype(jnp.float32)                # (1, 3)

    BT = B * T
    Mt = _choose_row_tile(BT)
    grid_len = pl.cdiv(BT, Mt)
    BT_pad = grid_len * Mt
    if BT_pad != BT:
        # ragged last tile (rare): pad rows, slice the result afterwards
        x = jnp.pad(x, ((0, BT_pad - BT), (0, 0), (0, 0)))

    y = pl.pallas_call(
        _snn_head_kernel,
        out_shape=jax.ShapeDtypeStruct((BT_pad, n_out), jnp.float32),
        grid_spec=pltpu.PrefetchScalarGridSpec(
            num_scalar_prefetch=0,
            grid=(grid_len,),
            in_specs=[
                pl.BlockSpec((Mt, 64, 4 * P), lambda i: (i, 0, 0)),
                pl.BlockSpec((n_in, n_out), lambda i: (0, 0)),
                pl.BlockSpec((1, n_out), lambda i: (0, 0)),
            ],
            out_specs=pl.BlockSpec((Mt, n_out), lambda i: (i, 0)),
        ),
        compiler_params=pltpu.CompilerParams(
            dimension_semantics=("parallel",),
            # <= physical VMEM on all generations; comfortably holds the double-buffered tile
            vmem_limit_bytes=32 * 1024 * 1024,
        ),
    )(x, w_t, bias)

    if BT_pad != BT:
        y = y[:BT]
    return y.reshape(B, T, n_out)


if __name__ == "__main__":
    key = jax.random.PRNGKey(0)
    # small shapes consistent with the module: 256 channels (4 groups of 64),
    # 4*H'*W' == 384 (Linear in-features), num_steps kept small (=8) for the example.
    B, T = 2, 8
    Hp, Wp = 8, 12
    k1, k2, k3 = jax.random.split(key, 3)
    out_from_net = jax.random.normal(k1, (B, 256, Hp, Wp, T), dtype=jnp.float32)
    fc_w = jax.random.normal(k2, (3, 384), dtype=jnp.float32) * 0.05   # nn.Linear(384, 3).weight
    fc_b = jax.random.normal(k3, (3,), dtype=jnp.float32) * 0.05       # nn.Linear(384, 3).bias

    y = jax.block_until_ready(snn_head_forward(out_from_net, fc_w, fc_b, num_steps=T))

    # pure-JAX reference of the same PyTorch forward (post-net part)
    out = jnp.transpose(out_from_net, (0, 4, 1, 2, 3))                 # [B, T, 256, H', W']
    groups = [jnp.sum(out[:, :, g * 64:(g + 1) * 64], axis=2) / 64 for g in range(4)]
    feat = jnp.concatenate(groups, axis=2).reshape(B, T, -1)           # [B, T, 384]
    ref = feat @ fc_w.T + fc_b                                         # [B, T, 3]
    assert y.shape == (B, T, 3)
    assert jnp.allclose(y, ref, atol=1e-4, rtol=1e-4)
    print("KERNEL_OK")
</pallas_src>

<mosaic_0001>
module attributes {stable_mosaic.version = 11 : i64} {
  func.func @_snn_head_kernel(%arg0: i32, %arg1: memref<8x64x384xf32, #tpu.memory_space<vmem>>, %arg2: memref<384x3xf32, #tpu.memory_space<vmem>>, %arg3: memref<1x3xf32, #tpu.memory_space<vmem>>, %arg4: memref<8x3xf32, #tpu.memory_space<vmem>>) attributes {dimension_semantics = [#tpu.dimension_semantics<parallel>], iteration_bounds = array<i64: 2>, scalar_prefetch = 0 : i64, scratch_operands = 0 : i64, tpu.core_type = #tpu.core_type<tc>, window_params = [{transform_indices = @transform_0, window_bounds = array<i64: 8, 64, 384>}, {pipeline_mode = #tpu.pipeline_mode<synchronous>, transform_indices = @transform_1, window_bounds = array<i64: 384, 3>}, {pipeline_mode = #tpu.pipeline_mode<synchronous>, transform_indices = @transform_2, window_bounds = array<i64: 1, 3>}, {transform_indices = @transform_3, window_bounds = array<i64: 8, 3>}]} {
    %c0 = arith.constant 0 : index
    %c0_0 = arith.constant 0 : index
    %c0_1 = arith.constant 0 : index
    %0 = vector.load %arg1[%c0, %c0_0, %c0_1] : memref<8x64x384xf32, #tpu.memory_space<vmem>>, vector<8x64x384xf32>
    %cst = arith.constant dense<0.000000e+00> : vector<8x384xf32>
    %1 = vector.multi_reduction <add>, %0, %cst [1] : vector<8x64x384xf32> to vector<8x384xf32>
    %c0_2 = arith.constant 0 : index
    %c0_3 = arith.constant 0 : index
    %2 = vector.load %arg2[%c0_2, %c0_3] : memref<384x3xf32, #tpu.memory_space<vmem>>, vector<384x3xf32>
    %cst_4 = arith.constant dense<0.000000e+00> : vector<8x3xf32>
    %3 = tpu.matmul %1, %2, %cst_4 {dimension_numbers = #tpu.dot_dimension_numbers<[1], [0], [0], [1], [0, 0, 1, 1], [], []>} : vector<8x384xf32>, vector<384x3xf32>, vector<8x3xf32> -> vector<8x3xf32>
    %c0_5 = arith.constant 0 : index
    %c0_6 = arith.constant 0 : index
    %4 = vector.load %arg3[%c0_5, %c0_6] : memref<1x3xf32, #tpu.memory_space<vmem>>, vector<1x3xf32>
    %5 = vector.broadcast %4 : vector<1x3xf32> to vector<8x3xf32>
    %6 = arith.addf %3, %5 : vector<8x3xf32>
    %c0_7 = arith.constant 0 : index
    %c0_8 = arith.constant 0 : index
    %7 = vector.load %arg4[%c0_7, %c0_8] : memref<8x3xf32, #tpu.memory_space<vmem>>, vector<8x3xf32>
    tpu.vector_store %arg4[%c0_7, %c0_8], %6 {strides = array<i32>} : memref<8x3xf32, #tpu.memory_space<vmem>>, vector<8x3xf32>,
    return
  }
  func.func @transform_0(%arg0: i32) -> (i32, i32, i32) {
    %c0_i32 = arith.constant 0 : i32
    %c0_i32_0 = arith.constant 0 : i32
    %c0_i32_1 = arith.constant 0 : i32
    return %arg0, %c0_i32, %c0_i32_0 : i32, i32, i32
  }
  func.func @transform_1(%arg0: i32) -> (i32, i32) {
    %c0_i32 = arith.constant 0 : i32
    %c0_i32_0 = arith.constant 0 : i32
    %c0_i32_1 = arith.constant 0 : i32
    return %c0_i32, %c0_i32_0 : i32, i32
  }
  func.func @transform_2(%arg0: i32) -> (i32, i32) {
    %c0_i32 = arith.constant 0 : i32
    %c0_i32_0 = arith.constant 0 : i32
    %c0_i32_1 = arith.constant 0 : i32
    return %c0_i32, %c0_i32_0 : i32, i32
  }
  func.func @transform_3(%arg0: i32) -> (i32, i32) {
    %c0_i32 = arith.constant 0 : i32
    %c0_i32_0 = arith.constant 0 : i32
    return %arg0, %c0_i32 : i32, i32
  }
}

</mosaic_0001>

<bundles_post_ra>
// kernel: tpu_custom_call.1
= control target key start
LH: loop header
LB: loop body
LE: loop exit
PB: predicated region body
PF: predicated region fallthrough
CT: control target
= control target key end

     0   :  { %8 = vsyncpa [#allocation3], 0  ;;  %s1615_s0 = inlined_call_operand.hbm [shape: f32[16,64,384], index: 0, kind: input, shape index: {}]   ;;  %s1616_s1 = inlined_call_operand.vmem [shape: f32[384,3], index: 1, kind: input, shape index: {}]   ;;  %s1617_s2 = inlined_call_operand.hbm [shape: f32[1,3], index: 2, kind: input, shape index: {}]   ;;  %s1618_s3 = inlined_call_operand.vmem [shape: f32[16,3], index: 3, kind: output, shape index: {}]  }
   0x1   :  { %10 = vsyncpa [#allocation3 + $0x1], 0 }
   0x2   :  { %11 = vsyncpa [#allocation5], 0  ;;  %s1147_s12 = smov 0   ;;  %s1149_s13 = smov 0  }
   0x3   :  { %s1151_s14 = smov 0   ;;  %s1153_s15 = smov 0  }
   0x4 LB: > { %s1166_s16 = sadd.s32 4294967295, %s1122_s15   ;;  %s1169_s17 = sadd.s32 1, %s1122_s15   ;;  %s1122_s15 = sphi %s1153_s15, %s1626_s15   ;;  %s1118_s14 = sphi %s1151_s14, %s1625_s14   ;;  %s1114_s13 = sphi %s1149_s13, %s1624_s13   ;;  %s1110_s12 = sphi %s1147_s12, %s1623_s12  }
   0x5   : > { %s21_s18 = ssub.s32 %s1122_s15, %s1169_s17  ;;  %s24_s19 = sadd.s32 1, %s1118_s14 }
   0x6   : > { %p22_p0 = scmp.eq.s32.totalorder %s21_s18, 0  ;;  %p31_p1 = scmp.ne.s32.totalorder %s1118_s14, %s1114_s13 }
   0x7   : > { %p32_p2 = scmp.eq.s32.totalorder %s1122_s15, 0  ;;  %p37_p3 = scmp.ne.s32.totalorder %s1114_s13, %s1110_s12 }
   0x8   : > { %s1179_s20 = scalar_select %p22_p0, %s1118_s14, %s24_s19  }
   0x9   : > { %p1181_p4 = por %p32_p2, %p31_p1  ;;  %p38_p5 = scmp.eq.s32.totalorder %s1166_s16, 0 }
   0xa   : > { %p957_p6 = scmp.ge.s32.totalorder %s1122_s15, 1  ;;  %p116_p7 = scmp.lt.s32.totalorder %s1122_s15, 3 }
   0xb   : > { %p1190_p8 = por %p38_p5, %p37_p3  ;;  %s131_s26 = sshll.u32 %s1617_s2, 4  ;;  %s132_s26 = int_to_ptr.hbm [resolvable:$true] %s131_s26 }
   0xc   : > { %p1194_p9 = pnand %p957_p6, %p116_p7  ;;  %s1124_s27 = smov [#allocation4]  }
   0xd   : > { %s133_s28 = sshll.u32 %s1124_s27, 4  ;;  %p986_p12 = scmp.lt.s32.totalorder %s1122_s15, 2  ;;  %s134_s28 = int_to_ptr.vmem [resolvable:$true] %s133_s28 }
   0xe   : > { %p977_p10 = pneg %p1194_p9  ;;  %s144_s29 = sand.u32 1, %s1118_s14  }
   0xf   : > { %s969_s30 = smul.u32 1536, %s1122_s15  ;;  %p1210_p13 = pnand %p986_p12, %p1181_p4 }
  0x10   : > { %p978_p11 = pnand %p977_p10, %p38_p5  ;;  %s968_s5 = smul.u32 1536, %s144_s29 }
  0x11   : > { %s154_s8 = scalar_lea.hbm %s1615_s0, %s969_s30  ;;  %s145_s12 = scalar_lea.sflag [#allocation3], %s144_s29 }
  0x12   : > { %980 = dma.hbm_to_vmem [thread:$0]  (!%p978_p11), %s132_s26, 16, %s134_s28, [#allocation5]  }
  0x13   : > { %s155_s9 = sshll.u32 %s154_s8, 4  ;;  %s148_s10 = scalar_lea.vmem [#allocation2], %s968_s5  ;;  %s156_s9 = int_to_ptr.hbm [resolvable:$true] %s155_s9 }
  0x14   : > { %s157_s11 = sshll.u32 %s148_s10, 4  ;;  %s1054_s18 = sshra.s32 %s156_s9, 4  ;;  %s158_s11 = int_to_ptr.vmem [resolvable:$true] %s157_s11  ;;  %s1055_s18 = int_to_ptr.hbm [resolvable:$true] %s1054_s18 }
  0x15   : > { %s1056_s15 = scalar_lea.hbm %s1055_s18, 1536  ;;  %p1058_p1 = pneg %p1210_p13 }
  0x16   : > { %p1057_p0 = scmp.ne.s32.totalorder %s1055_s18, %s1056_s15  ;;  %s1061_s24 = scalar_lea.hbm %s1615_s0, 3072 }
  0x17   : > { %p1062_p4 = scmp.lt.s32.totalorder %s1055_s18, %s1615_s0  ;;  %p1063_p6 = scmp.lt.s32.totalorder %s1061_s24, %s1056_s15 }
  0x18   : > { %p1059_p2 = pnand %p1058_p1, %p1057_p0 }
  0x19   : > { %p1064_p7 = por %p1063_p6, %p1062_p4 }
  0x1a   : > { %p1060_p3 = pneg %p1059_p2 }
  0x1c   : > { %p1065_p10 = pnand %p1064_p7, %p1060_p3 }
  0x1e   : > { %1068 = shalt.err (!%p1065_p10)
}
  0x1f   : > { %s1125_s27 = smov 384   ;;  %s1126_s28 = smov 24  }
  0x20   : > { %984 = dma.hbm_to_vmem [thread:$0]  (!%p1210_p13), %s156_s9, 24576, %s158_s11, %s145_s12, %s1125_s27, %s1125_s27, %s1126_s28  }
  0x21   : > { %169 = sbr.rel (%p1194_p9) target bundleno = 286 (0x11e), region = 32  ;;  %s171_s29 = sand.u32 (!%p1194_p9), 1, %s1114_s13  }
  0x22   : > { %s970_s30 = smul.u32 (!%p1194_p9), 1536, %s171_s29  ;;  %s172_s5 = scalar_lea.sflag (!%p1194_p9), [#allocation3], %s171_s29 }
  0x24   : > { %s1230_s6 = scalar_lea.vmem (!%p1194_p9), [#allocation2], %s970_s30 }
  0x26   : > { %1101 = dma.done.wait (%p1190_p8), %s172_s5, 24576  }
  0x27   : > { %1103 = vsyncadd (%p1190_p8), %s172_s5, 4294942720 }
  0x28   : > { %1105 = dma.done.wait (%p38_p5), [#allocation5], 16  }
  0x29   : > { %1107 = vsyncadd (%p38_p5), [#allocation5], 4294967280  ;;  %v759_v0 = vld [vmem:[%s1616_s1 + $0x178] sm:$0xff]  ;;  %v758_v2 = vld [vmem:[%s1616_s1 + $0x170] sm:$0xff]  ;;  %vm788_vm0 = vcmask 1041409   ;;  %vm790_vm1 = vcmask 1042434  }
  0x2a   : > { %v727_v1 = vld [vmem:[%s1616_s1 + $0x78] sm:$0xff]  ;;  %859 = vmatpush.msra.mxu2 %v759_v0  ;;  %v726_v3 = vld [vmem:[%s1616_s1 + $0x70] sm:$0xff]  ;;  %v757_v5 = vld [vmem:[%s1616_s1 + $0x168] sm:$0xff]  ;;  %vm792_vm2 = vcmask 1043459   ;;  %vm794_vm3 = vcmask 1044484   ;;  %vm796_vm4 = vcmask 1045509  }
  0x2b   : > { %819 = vmatpush.msra.mxu0 %v727_v1  ;;  %v743_v4 = vld [vmem:[%s1616_s1 + $0xf8] sm:$0xff]  ;;  %v725_v6 = vld [vmem:[%s1616_s1 + $0x68] sm:$0xff]  ;;  %v742_v7 = vld [vmem:[%s1616_s1 + $0xf0] sm:$0xff]  ;;  %vm798_vm5 = vcmask 1046534   ;;  %vm800_vm6 = vcmask 1047559   ;;  %p204_p5 = scmp.lt.s32.totalorder %s1166_s16, 1 }
  0x2c   : > { %839 = vmatpush.msra.mxu1 %v743_v4  ;;  %860 = vmatpush.msra.mxu2 %v758_v2  ;;  %v741_v8 = vld [vmem:[%s1616_s1 + $0xe8] sm:$0xff]  ;;  %v756_v9 = vld [vmem:[%s1616_s1 + $0x160] sm:$0xff]  ;;  %v755_v12 = vld [vmem:[%s1616_s1 + $0x158] sm:$0xff]  ;;  %vm879_vm7 = vcmask 23552  }
  0x2d   : > { %820 = vmatpush.msra.mxu0 %v726_v3  ;;  %v724_v10 = vld [vmem:[%s1616_s1 + $0x60] sm:$0xff]  ;;  %v723_v13 = vld [vmem:[%s1616_s1 + $0x58] sm:$0xff]  ;;  %v754_v15 = vld [vmem:[%s1616_s1 + $0x150] sm:$0xff]  ;;  %s1628_s16 = smov (!%p204_p5, %s1166_s16), 1 }
  0x2e   : > { %840 = vmatpush.msra.mxu1 %v742_v7  ;;  %861 = vmatpush.msra.mxu2 %v757_v5  ;;  %v740_v11 = vld [vmem:[%s1616_s1 + $0xe0] sm:$0xff]  ;;  %v739_v14 = vld [vmem:[%s1616_s1 + $0xd8] sm:$0xff]  ;;  %v722_v16 = vld [vmem:[%s1616_s1 + $0x50] sm:$0xff] }
  0x2f   : > { %821 = vmatpush.msra.mxu0 %v725_v6  ;;  %v738_v17 = vld [vmem:[%s1616_s1 + $0xd0] sm:$0xff]  ;;  %v753_v18 = vld [vmem:[%s1616_s1 + $0x148] sm:$0xff]  ;;  %v752_v21 = vld [vmem:[%s1616_s1 + $0x140] sm:$0xff] }
  0x30   : > { %841 = vmatpush.msra.mxu1 %v741_v8  ;;  %862 = vmatpush.msra.mxu2 %v756_v9  ;;  %v721_v19 = vld [vmem:[%s1616_s1 + $0x48] sm:$0xff]  ;;  %v720_v22 = vld [vmem:[%s1616_s1 + $0x40] sm:$0xff]  ;;  %v751_v23 = vld [vmem:[%s1616_s1 + $0x138] sm:$0xff] }
  0x31   : > { %822 = vmatpush.msra.mxu0 %v724_v10  ;;  %v737_v20 = vld [vmem:[%s1616_s1 + $0xc8] sm:$0xff]  ;;  %v736_v24 = vld [vmem:[%s1616_s1 + $0xc0] sm:$0xff]  ;;  %v719_v25 = vld [vmem:[%s1616_s1 + $0x38] sm:$0xff] }
  0x32   : > { %842 = vmatpush.msra.mxu1 %v740_v11  ;;  %863 = vmatpush.msra.mxu2 %v755_v12  ;;  %v750_v26 = vld [vmem:[%s1616_s1 + $0x130] sm:$0xff]  ;;  %v735_v27 = vld [vmem:[%s1616_s1 + $0xb8] sm:$0xff]  ;;  %v213_v29 = vld [vmem:[%s1230_s6 + $0x28] sm:$0xff] }
  0x33   : > { %823 = vmatpush.msra.mxu0 %v723_v13  ;;  %v210_v28 = vld [vmem:[%s1230_s6 + $0x10] sm:$0xff]  ;;  %v216_v30 = vld [vmem:[%s1230_s6 + $0x40] sm:$0xff]  ;;  %v749_v32 = vld [vmem:[%s1616_s1 + $0x128] sm:$0xff] }
  0x34   : > { %843 = vmatpush.msra.mxu1 %v739_v14  ;;  %864 = vmatpush.msra.mxu2 %v754_v15  ;;  %v718_v31 = vld [vmem:[%s1616_s1 + $0x30] sm:$0xff]  ;;  %v717_v33 = vld [vmem:[%s1616_s1 + $0x28] sm:$0xff]  ;;  %v426_v34 = vadd.f32 %v213_v29, %v210_v28  ;;  %v219_v36 = vld [vmem:[%s1230_s6 + $0x58] sm:$0xff] }
  0x35   : > { %824 = vmatpush.msra.mxu0 %v722_v16  ;;  %v734_v35 = vld [vmem:[%s1616_s1 + $0xb0] sm:$0xff]  ;;  %v748_v38 = vld [vmem:[%s1616_s1 + $0x120] sm:$0xff]  ;;  %v237_v40 = vld [vmem:[%s1230_s6 + $0xe8] sm:$0xff] }
  0x36   : > { %844 = vmatpush.msra.mxu1 %v738_v17  ;;  %865 = vmatpush.msra.mxu2 %v753_v18  ;;  %v234_v37 = vld [vmem:[%s1230_s6 + $0xd0] sm:$0xff]  ;;  %v716_v39 = vld [vmem:[%s1616_s1 + $0x20] sm:$0xff]  ;;  %v427_v42 = vadd.f32 %v426_v34, %v216_v30  ;;  %v733_v43 = vld [vmem:[%s1616_s1 + $0xa8] sm:$0xff] }
  0x37   : > { %825 = vmatpush.msra.mxu0 %v721_v19  ;;  %v240_v41 = vld [vmem:[%s1230_s6 + $0x100] sm:$0xff]  ;;  %v222_v45 = vld [vmem:[%s1230_s6 + $0x70] sm:$0xff]  ;;  %v465_v46 = vadd.f32 %v237_v40, %v234_v37  ;;  %v747_v47 = vld [vmem:[%s1616_s1 + $0x118] sm:$0xff] }
  0x38   : > { %845 = vmatpush.msra.mxu1 %v737_v20  ;;  %866 = vmatpush.msra.mxu2 %v752_v21  ;;  %v732_v44 = vld [vmem:[%s1616_s1 + $0xa0] sm:$0xff]  ;;  %v715_v48 = vld [vmem:[%s1616_s1 + $0x18] sm:$0xff]  ;;  %v258_v50 = vld [vmem:[%s1230_s6 + $0x190] sm:$0xff]  ;;  %v428_v52 = vadd.f32 %v427_v42, %v219_v36 }
  0x39   : > { %826 = vmatpush.msra.mxu0 %v720_v22  ;;  %v243_v49 = vld [vmem:[%s1230_s6 + $0x118] sm:$0xff]  ;;  %v261_v51 = vld [vmem:[%s1230_s6 + $0x1a8] sm:$0xff]  ;;  %v264_v55 = vld [vmem:[%s1230_s6 + $0x1c0] sm:$0xff]  ;;  %v466_v56 = vadd.f32 %v465_v46, %v240_v41 }
  0x3a   : > { %846 = vmatpush.msra.mxu1 %v736_v24  ;;  %867 = vmatpush.msra.mxu2 %v751_v23  ;;  %v731_v53 = vld [vmem:[%s1616_s1 + $0x98] sm:$0xff]  ;;  %v225_v54 = vld [vmem:[%s1230_s6 + $0x88] sm:$0xff]  ;;  %v504_v57 = vadd.f32 %v261_v51, %v258_v50  ;;  %v746_v58 = vld [vmem:[%s1616_s1 + $0x110] sm:$0xff]  ;;  %v429_v63 = vadd.f32 %v428_v52, %v222_v45 }
  0x3b   : > { %827 = vmatpush.msra.mxu0 %v719_v25  ;;  %v714_v59 = vld [vmem:[%s1616_s1 + $0x10] sm:$0xff]  ;;  %v228_v60 = vld [vmem:[%s1230_s6 + $0xa0] sm:$0xff]  ;;  %v267_v62 = vld [vmem:[%s1230_s6 + $0x1d8] sm:$0xff]  ;;  %v467_v4 = vadd.f32 %v466_v56, %v243_v49 }
  0x3c   : > { %847 = vmatpush.msra.mxu1 %v735_v27  ;;  %868 = vmatpush.msra.mxu2 %v750_v26  ;;  %v246_v61 = vld [vmem:[%s1230_s6 + $0x130] sm:$0xff]  ;;  %v285_v2 = vld [vmem:[%s1230_s6 + $0x268] sm:$0xff]  ;;  %v288_v3 = vld [vmem:[%s1230_s6 + $0x280] sm:$0xff]  ;;  %v505_v5 = vadd.f32 %v504_v57, %v264_v55  ;;  %v430_v11 = vadd.f32 %v429_v63, %v225_v54 }
  0x3d   : > { %828 = vmatpush.msra.mxu0 %v718_v31  ;;  %v730_v0 = vld [vmem:[%s1616_s1 + $0x90] sm:$0xff]  ;;  %v745_v6 = vld [vmem:[%s1616_s1 + $0x108] sm:$0xff]  ;;  %v231_v8 = vld [vmem:[%s1230_s6 + $0xb8] sm:$0xff]  ;;  %v468_v16 = vadd.f32 %v467_v4, %v246_v61 }
  0x3e   : > { %848 = vmatpush.msra.mxu1 %v734_v35  ;;  %869 = vmatpush.msra.mxu2 %v749_v32  ;;  %v282_v1 = vld [vmem:[%s1230_s6 + $0x250] sm:$0xff]  ;;  %v713_v7 = vld [vmem:[%s1616_s1 + $0x8] sm:$0xff]  ;;  %v252_v13 = vld [vmem:[%s1230_s6 + $0x160] sm:$0xff]  ;;  %v506_v17 = vadd.f32 %v505_v5, %v267_v62  ;;  %v431_v22 = vadd.f32 %v430_v11, %v228_v60 }
  0x3f   : > { %829 = vmatpush.msra.mxu0 %v717_v33  ;;  %v249_v9 = vld [vmem:[%s1230_s6 + $0x148] sm:$0xff]  ;;  %v270_v10 = vld [vmem:[%s1230_s6 + $0x1f0] sm:$0xff]  ;;  %v543_v12 = vadd.f32 %v285_v2, %v282_v1  ;;  %v291_v14 = vld [vmem:[%s1230_s6 + $0x298] sm:$0xff] }
  0x40   : > { %849 = vmatpush.msra.mxu1 %v733_v43  ;;  %870 = vmatpush.msra.mxu2 %v748_v38  ;;  %v306_v15 = vld [vmem:[%s1230_s6 + $0x310] sm:$0xff]  ;;  %v744_v18 = vld [vmem:[%s1616_s1 + $0x100] sm:$0xff]  ;;  %v273_v19 = vld [vmem:[%s1230_s6 + $0x208] sm:$0xff]  ;;  %v469_v27 = vadd.f32 %v468_v16, %v249_v9  ;;  %v507_v28 = vadd.f32 %v506_v17, %v270_v10  ;;  %v432_v33 = vadd.f32 %v431_v22, %v231_v8 }
  0x41   : > { %830 = vmatpush.msra.mxu0 %v716_v39  ;;  %v309_v20 = vld [vmem:[%s1230_s6 + $0x328] sm:$0xff]  ;;  %v312_v21 = vld [vmem:[%s1230_s6 + $0x340] sm:$0xff]  ;;  %v544_v23 = vadd.f32 %v543_v12, %v288_v3  ;;  %v255_v24 = vld [vmem:[%s1230_s6 + $0x178] sm:$0xff] }
  0x42   : > { %850 = vmatpush.msra.mxu1 %v732_v44  ;;  %871 = vmatpush.msra.mxu2 %v747_v47  ;;  %v276_v25 = vld [vmem:[%s1230_s6 + $0x220] sm:$0xff]  ;;  %v294_v26 = vld [vmem:[%s1230_s6 + $0x2b0] sm:$0xff]  ;;  %v582_v29 = vadd.f32 %v309_v20, %v306_v15  ;;  %v315_v30 = vld [vmem:[%s1230_s6 + $0x358] sm:$0xff]  ;;  %v470_v38 = vadd.f32 %v469_v27, %v252_v13  ;;  %v508_v39 = vadd.f32 %v507_v28, %v273_v19  ;;  %v433_v44 = vrot.slane %v432_v33, 4 }
  0x43   : > { %831 = vmatpush.msra.mxu0 %v715_v48  ;;  %v330_v31 = vld [vmem:[%s1230_s6 + $0x3d0] sm:$0xff]  ;;  %v333_v32 = vld [vmem:[%s1230_s6 + $0x3e8] sm:$0xff]  ;;  %v545_v34 = vadd.f32 %v544_v23, %v291_v14  ;;  %v279_v35 = vld [vmem:[%s1230_s6 + $0x238] sm:$0xff] }
  0x44   : > { %851 = vmatpush.msra.mxu1 %v731_v53  ;;  %872 = vmatpush.msra.mxu2 %v746_v58  ;;  %v297_v36 = vld [vmem:[%s1230_s6 + $0x2c8] sm:$0xff]  ;;  %v336_v37 = vld [vmem:[%s1230_s6 + $0x400] sm:$0xff]  ;;  %v583_v40 = vadd.f32 %v582_v29, %v312_v21  ;;  %v318_v42 = vld [vmem:[%s1230_s6 + $0x370] sm:$0xff]  ;;  %v621_v46 = vadd.f32 %v333_v32, %v330_v31  ;;  %v471_v50 = vadd.f32 %v470_v38, %v255_v24 }
  0x45   : > { %832 = vmatpush.msra.mxu0 %v714_v59  ;;  %v300_v41 = vld [vmem:[%s1230_s6 + $0x2e0] sm:$0xff]  ;;  %v339_v43 = vld [vmem:[%s1230_s6 + $0x418] sm:$0xff]  ;;  %v546_v45 = vadd.f32 %v545_v34, %v294_v26  ;;  %v354_v47 = vld [vmem:[%s1230_s6 + $0x490] sm:$0xff]  ;;  %v509_v51 = vadd.f32 %v508_v39, %v276_v25  ;;  %v434_v55 = vadd.f32 %v433_v44, %v432_v33 }
  0x46   : > { %852 = vmatpush.msra.mxu1 %v730_v0  ;;  %873 = vmatpush.msra.mxu2 %v745_v6  ;;  %v357_v48 = vld [vmem:[%s1230_s6 + $0x4a8] sm:$0xff]  ;;  %v360_v49 = vld [vmem:[%s1230_s6 + $0x4c0] sm:$0xff]  ;;  %v584_v52 = vadd.f32 %v583_v40, %v315_v30  ;;  %v303_v53 = vld [vmem:[%s1230_s6 + $0x2f8] sm:$0xff]  ;;  %v622_v57 = vadd.f32 %v621_v46, %v336_v37  ;;  %v472_v62 = vrot.slane %v471_v50, 4 }
  0x47   : > { %833 = vmatpush.msra.mxu0 %v713_v7  ;;  %v321_v54 = vld [vmem:[%s1230_s6 + $0x388] sm:$0xff]  ;;  %v547_v56 = vadd.f32 %v546_v45, %v297_v36  ;;  %v660_v58 = vadd.f32 %v357_v48, %v354_v47  ;;  %v342_v59 = vld [vmem:[%s1230_s6 + $0x430] sm:$0xff]  ;;  %v363_v60 = vld [vmem:[%s1230_s6 + $0x4d8] sm:$0xff]  ;;  %v510_v63 = vadd.f32 %v509_v51, %v279_v35  ;;  %v435_v4 = vrot.slane %v434_v55, 2 }
  0x48   : > { %874 = vmatpush.msra.mxu2 %v744_v18  ;;  %v378_v61 = vld [vmem:[%s1230_s6 + $0x550] sm:$0xff]  ;;  %v585_v0 = vadd.f32 %v584_v52, %v318_v42  ;;  %v324_v1 = vld [vmem:[%s1230_s6 + $0x3a0] sm:$0xff]  ;;  %v381_v2 = vld [vmem:[%s1230_s6 + $0x568] sm:$0xff]  ;;  %v623_v6 = vadd.f32 %v622_v57, %v339_v43  ;;  %v473_v11 = vadd.f32 %v472_v62, %v471_v50 }
  0x49   : > { %v384_v3 = vld [vmem:[%s1230_s6 + $0x580] sm:$0xff]  ;;  %v548_v5 = vadd.f32 %v547_v56, %v300_v41  ;;  %v661_v7 = vadd.f32 %v660_v58, %v360_v49  ;;  %v327_v8 = vld [vmem:[%s1230_s6 + $0x3b8] sm:$0xff]  ;;  %v345_v9 = vld [vmem:[%s1230_s6 + $0x448] sm:$0xff]  ;;  %v511_v12 = vrot.slane %v510_v63, 4  ;;  %v699_v14 = vadd.f32 %v381_v2, %v378_v61 }
  0x4a   : > { %v366_v10 = vld [vmem:[%s1230_s6 + $0x4f0] sm:$0xff]  ;;  %v586_v13 = vadd.f32 %v585_v0, %v321_v54  ;;  %v387_v15 = vld [vmem:[%s1230_s6 + $0x598] sm:$0xff]  ;;  %v436_v16 = vadd.f32 %v435_v4, %v434_v55  ;;  %v624_v18 = vadd.f32 %v623_v6, %v342_v59  ;;  %v712_v20 = vld [vmem:[%s1616_s1] sm:$0xff]  ;;  %v474_v24 = vrot.slane %v473_v11, 2 }
  0x4b   : > { %v549_v17 = vadd.f32 %v548_v5, %v303_v53  ;;  %v662_v19 = vadd.f32 %v661_v7, %v363_v60  ;;  %v729_v21 = vld [vmem:[%s1616_s1 + $0x88] sm:$0xff]  ;;  %v348_v22 = vld [vmem:[%s1230_s6 + $0x460] sm:$0xff]  ;;  %v512_v25 = vadd.f32 %v511_v12, %v510_v63  ;;  %v700_v27 = vadd.f32 %v699_v14, %v384_v3  ;;  %834 = vmatpush.msra.mxu0 %v712_v20  ;;  %v351_v28 = vld [vmem:[%s1230_s6 + $0x478] sm:$0xff] }
  0x4c   : > { %v369_v23 = vld [vmem:[%s1230_s6 + $0x508] sm:$0xff]  ;;  %v587_v26 = vadd.f32 %v586_v13, %v324_v1  ;;  %853 = vmatpush.msra.mxu1 %v729_v21  ;;  %v390_v29 = vld [vmem:[%s1230_s6 + $0x5b0] sm:$0xff]  ;;  %v437_v30 = vrot.slane %v436_v16, 1  ;;  %v625_v32 = vadd.f32 %v624_v18, %v345_v9  ;;  %v372_v34 = vld [vmem:[%s1230_s6 + $0x520] sm:$0xff]  ;;  %v475_v35 = vadd.f32 %v474_v24, %v473_v11 }
  0x4d   : > { %v550_v31 = vrot.slane %v549_v17, 4  ;;  %v663_v33 = vadd.f32 %v662_v19, %v366_v10  ;;  %v513_v36 = vrot.slane %v512_v25, 2  ;;  %v701_v38 = vadd.f32 %v700_v27, %v387_v15  ;;  %v208_v39 = vld [vmem:[%s1230_s6] sm:$0xff]  ;;  %v211_v40 = vld [vmem:[%s1230_s6 + $0x18] sm:$0xff]  ;;  %v393_v41 = vld [vmem:[%s1230_s6 + $0x5c8] sm:$0xff] }
  0x4e   : > { %v588_v37 = vadd.f32 %v587_v26, %v327_v8  ;;  %v438_v42 = vadd.f32 %v437_v30, %v436_v16  ;;  %v626_v44 = vadd.f32 %v625_v32, %v348_v22  ;;  %v375_v46 = vld [vmem:[%s1230_s6 + $0x538] sm:$0xff]  ;;  %v476_v47 = vrot.slane %v475_v35, 1  ;;  %v214_v51 = vld [vmem:[%s1230_s6 + $0x30] sm:$0xff]  ;;  %v396_v52 = vld [vmem:[%s1230_s6 + $0x5e0] sm:$0xff] }
  0x4f   : > { %v551_v43 = vadd.f32 %v550_v31, %v549_v17  ;;  %v664_v45 = vadd.f32 %v663_v33, %v369_v23  ;;  %v514_v48 = vadd.f32 %v513_v36, %v512_v25  ;;  %v702_v50 = vadd.f32 %v701_v38, %v390_v29  ;;  %v217_v61 = vld [vmem:[%s1230_s6 + $0x48] sm:$0xff]  ;;  %v399_v62 = vld [vmem:[%s1230_s6 + $0x5f8] sm:$0xff]  ;;  %v232_v2 = vld [vmem:[%s1230_s6 + $0xc0] sm:$0xff] }
  0x50   : > { %v589_v49 = vrot.slane %v588_v37, 4  ;;  %v627_v54 = vadd.f32 %v626_v44, %v351_v28  ;;  %v400_v56 = vadd.f32 %v211_v40, %v208_v39  ;;  %v477_v57 = vadd.f32 %v476_v47, %v475_v35  ;;  %v235_v3 = vld [vmem:[%s1230_s6 + $0xd8] sm:$0xff]  ;;  %v220_v9 = vld [vmem:[%s1230_s6 + $0x60] sm:$0xff]  ;;  %v238_v13 = vld [vmem:[%s1230_s6 + $0xf0] sm:$0xff] }
  0x51   : > { %v552_v53 = vrot.slane %v551_v43, 2  ;;  %v665_v55 = vadd.f32 %v664_v45, %v372_v34  ;;  %v515_v58 = vrot.slane %v514_v48, 1  ;;  %v703_v60 = vadd.f32 %v702_v50, %v393_v41  ;;  %v256_v14 = vld [vmem:[%s1230_s6 + $0x180] sm:$0xff]  ;;  %v259_v15 = vld [vmem:[%s1230_s6 + $0x198] sm:$0xff]  ;;  %v241_v25 = vld [vmem:[%s1230_s6 + $0x108] sm:$0xff] }
  0x52   : > { %v590_v59 = vadd.f32 %v589_v49, %v588_v37  ;;  %v628_v0 = vrot.slane %v627_v54, 4  ;;  %v401_v4 = vadd.f32 %v400_v56, %v214_v51  ;;  %v809_v8 = vsel %vm788_vm0, %v477_v57, %v438_v42  ;;  %v223_v20 = vld [vmem:[%s1230_s6 + $0x78] sm:$0xff]  ;;  %v262_v26 = vld [vmem:[%s1230_s6 + $0x1b0] sm:$0xff]  ;;  %v280_v31 = vld [vmem:[%s1230_s6 + $0x240] sm:$0xff] }
  0x53   : > { %v553_v63 = vadd.f32 %v552_v53, %v551_v43  ;;  %v666_v1 = vadd.f32 %v665_v55, %v375_v46  ;;  %v516_v5 = vadd.f32 %v515_v58, %v514_v48  ;;  %v704_v7 = vadd.f32 %v703_v60, %v396_v52  ;;  %v226_v30 = vld [vmem:[%s1230_s6 + $0x90] sm:$0xff]  ;;  %v283_v32 = vld [vmem:[%s1230_s6 + $0x258] sm:$0xff]  ;;  %v244_v38 = vld [vmem:[%s1230_s6 + $0x120] sm:$0xff] }
  0x54   : > { %v591_v6 = vrot.slane %v590_v59, 2  ;;  %v629_v11 = vadd.f32 %v628_v0, %v627_v54  ;;  %v402_v16 = vadd.f32 %v401_v4, %v217_v61  ;;  %v439_v21 = vadd.f32 %v235_v3, %v232_v2  ;;  %v265_v39 = vld [vmem:[%s1230_s6 + $0x1c8] sm:$0xff]  ;;  %v247_v44 = vld [vmem:[%s1230_s6 + $0x138] sm:$0xff]  ;;  %v286_v45 = vld [vmem:[%s1230_s6 + $0x270] sm:$0xff] }
  0x55   : > { %v554_v10 = vrot.slane %v553_v63, 1  ;;  %v667_v12 = vrot.slane %v666_v1, 4  ;;  %v705_v18 = vadd.f32 %v704_v7, %v399_v62  ;;  %v810_v19 = vsel %vm790_vm1, %v516_v5, %v809_v8  ;;  %v229_v43 = vld [vmem:[%s1230_s6 + $0xa8] sm:$0xff]  ;;  %v268_v50 = vld [vmem:[%s1230_s6 + $0x1e0] sm:$0xff]  ;;  %v307_v52 = vld [vmem:[%s1230_s6 + $0x318] sm:$0xff] }
  0x56   : > { %v592_v17 = vadd.f32 %v591_v6, %v590_v59  ;;  %v630_v23 = vrot.slane %v629_v11, 2  ;;  %v403_v27 = vadd.f32 %v402_v16, %v220_v9  ;;  %v440_v33 = vadd.f32 %v439_v21, %v238_v13  ;;  %v304_v51 = vld [vmem:[%s1230_s6 + $0x300] sm:$0xff]  ;;  %v250_v57 = vld [vmem:[%s1230_s6 + $0x150] sm:$0xff]  ;;  %v289_v58 = vld [vmem:[%s1230_s6 + $0x288] sm:$0xff] }
  0x57   : > { %v555_v22 = vadd.f32 %v554_v10, %v553_v63  ;;  %v668_v24 = vadd.f32 %v667_v12, %v666_v1  ;;  %v706_v29 = vrot.slane %v705_v18, 4  ;;  %v478_v34 = vadd.f32 %v259_v15, %v256_v14  ;;  %v253_v63 = vld [vmem:[%s1230_s6 + $0x168] sm:$0xff]  ;;  %v271_v0 = vld [vmem:[%s1230_s6 + $0x1f8] sm:$0xff]  ;;  %v310_v1 = vld [vmem:[%s1230_s6 + $0x330] sm:$0xff] }
  0x58   : > { %v593_v28 = vrot.slane %v592_v17, 1  ;;  %v631_v35 = vadd.f32 %v630_v23, %v629_v11  ;;  %v404_v40 = vadd.f32 %v403_v27, %v223_v20  ;;  %v441_v46 = vadd.f32 %v440_v33, %v241_v25  ;;  %v292_v5 = vld [vmem:[%s1230_s6 + $0x2a0] sm:$0xff]  ;;  %v331_v7 = vld [vmem:[%s1230_s6 + $0x3d8] sm:$0xff]  ;;  %v274_v13 = vld [vmem:[%s1230_s6 + $0x210] sm:$0xff] }
  0x59   : > { %v669_v36 = vrot.slane %v668_v24, 2  ;;  %v811_v37 = vsel %vm792_vm2, %v555_v22, %v810_v19  ;;  %v707_v42 = vadd.f32 %v706_v29, %v705_v18  ;;  %v479_v47 = vadd.f32 %v478_v34, %v262_v26  ;;  %v328_v6 = vld [vmem:[%s1230_s6 + $0x3c0] sm:$0xff]  ;;  %v295_v14 = vld [vmem:[%s1230_s6 + $0x2b8] sm:$0xff]  ;;  %v313_v15 = vld [vmem:[%s1230_s6 + $0x348] sm:$0xff] }
  0x5a   : > { %v594_v41 = vadd.f32 %v593_v28, %v592_v17  ;;  %v632_v48 = vrot.slane %v631_v35, 1  ;;  %v405_v53 = vadd.f32 %v404_v40, %v226_v30  ;;  %v517_v54 = vadd.f32 %v283_v32, %v280_v31  ;;  %v334_v19 = vld [vmem:[%s1230_s6 + $0x3f0] sm:$0xff]  ;;  %v352_v20 = vld [vmem:[%s1230_s6 + $0x480] sm:$0xff]  ;;  %v355_v21 = vld [vmem:[%s1230_s6 + $0x498] sm:$0xff] }
  0x5b   : > { %v670_v49 = vadd.f32 %v669_v36, %v668_v24  ;;  %v708_v55 = vrot.slane %v707_v42, 2  ;;  %v442_v59 = vadd.f32 %v441_v46, %v244_v38  ;;  %v480_v60 = vadd.f32 %v479_v47, %v265_v39  ;;  %v277_v26 = vld [vmem:[%s1230_s6 + $0x228] sm:$0xff]  ;;  %v316_v27 = vld [vmem:[%s1230_s6 + $0x360] sm:$0xff]  ;;  %v298_v33 = vld [vmem:[%s1230_s6 + $0x2d0] sm:$0xff] }
  0x5c   : > { %v812_v56 = vsel %vm794_vm3, %v594_v41, %v811_v37  ;;  %v633_v61 = vadd.f32 %v632_v48, %v631_v35  ;;  %v406_v2 = vadd.f32 %v405_v53, %v229_v43  ;;  %v518_v3 = vadd.f32 %v517_v54, %v286_v45  ;;  %v728_v31 = vld [vmem:[%s1616_s1 + $0x80] sm:$0xff]  ;;  %v337_v34 = vld [vmem:[%s1230_s6 + $0x408] sm:$0xff]  ;;  %v358_v35 = vld [vmem:[%s1230_s6 + $0x4b0] sm:$0xff] }
  0x5d   : > { %v671_v62 = vrot.slane %v670_v49, 1  ;;  %v709_v4 = vadd.f32 %v708_v55, %v707_v42  ;;  %v443_v8 = vadd.f32 %v442_v59, %v247_v44  ;;  %v481_v9 = vadd.f32 %v480_v60, %v268_v50  ;;  %854 = vmatpush.msra.mxu1 %v728_v31  ;;  %v319_v39 = vld [vmem:[%s1230_s6 + $0x378] sm:$0xff]  ;;  %v376_v40 = vld [vmem:[%s1230_s6 + $0x540] sm:$0xff]  ;;  %v301_v47 = vld [vmem:[%s1230_s6 + $0x2e8] sm:$0xff] }
  0x5e   : > { %v556_v10 = vadd.f32 %v307_v52, %v304_v51  ;;  %v813_v12 = vsel %vm796_vm4, %v633_v61, %v812_v56  ;;  %v407_v16 = vrot.slane %v406_v2, 4  ;;  %v519_v17 = vadd.f32 %v518_v3, %v289_v58  ;;  %v379_v41 = vld [vmem:[%s1230_s6 + $0x558] sm:$0xff]  ;;  %v340_v48 = vld [vmem:[%s1230_s6 + $0x420] sm:$0xff]  ;;  %v322_v53 = vld [vmem:[%s1230_s6 + $0x390] sm:$0xff] }
  0x5f   : > { %v672_v11 = vadd.f32 %v671_v62, %v670_v49  ;;  %v710_v18 = vrot.slane %v709_v4, 1  ;;  %v444_v22 = vadd.f32 %v443_v8, %v250_v57  ;;  %v482_v23 = vadd.f32 %v481_v9, %v271_v0  ;;  %v361_v49 = vld [vmem:[%s1230_s6 + $0x4c8] sm:$0xff]  ;;  %v382_v54 = vld [vmem:[%s1230_s6 + $0x570] sm:$0xff]  ;;  %v343_v59 = vld [vmem:[%s1230_s6 + $0x438] sm:$0xff] }
  0x60   : > { %v557_v24 = vadd.f32 %v556_v10, %v310_v1  ;;  %v408_v28 = vadd.f32 %v407_v16, %v406_v2  ;;  %v520_v29 = vadd.f32 %v519_v17, %v292_v5  ;;  %v595_v30 = vadd.f32 %v331_v7, %v328_v6  ;;  %v364_v60 = vld [vmem:[%s1230_s6 + $0x4e0] sm:$0xff]  ;;  %v325_v1 = vld [vmem:[%s1230_s6 + $0x3a8] sm:$0xff]  ;;  %v346_v2 = vld [vmem:[%s1230_s6 + $0x450] sm:$0xff] }
  0x61   : > { %v814_v25 = vsel %vm798_vm5, %v672_v11, %v813_v12  ;;  %v711_v32 = vadd.f32 %v710_v18, %v709_v4  ;;  %v445_v36 = vadd.f32 %v444_v22, %v253_v63  ;;  %v483_v37 = vadd.f32 %v482_v23, %v274_v13  ;;  %v385_v3 = vld [vmem:[%s1230_s6 + $0x588] sm:$0xff]  ;;  %v367_v8 = vld [vmem:[%s1230_s6 + $0x4f8] sm:$0xff] }
  0x62   : > { %v558_v38 = vadd.f32 %v557_v24, %v313_v15  ;;  %v409_v42 = vrot.slane %v408_v28, 2  ;;  %v521_v43 = vadd.f32 %v520_v29, %v295_v14  ;;  %v596_v44 = vadd.f32 %v595_v30, %v334_v19  ;;  %v209_v13 = vld [vmem:[%s1230_s6 + $0x8] sm:$0xff]  ;;  %v212_v14 = vld [vmem:[%s1230_s6 + $0x20] sm:$0xff] }
  0x63   : > { %v634_v45 = vadd.f32 %v355_v21, %v352_v20  ;;  %v815_v46 = vsel %vm800_vm6, %v711_v32, %v814_v25  ;;  %v446_v50 = vrot.slane %v445_v36, 4  ;;  %v484_v51 = vadd.f32 %v483_v37, %v277_v26  ;;  %v388_v15 = vld [vmem:[%s1230_s6 + $0x5a0] sm:$0xff]  ;;  %v349_v20 = vld [vmem:[%s1230_s6 + $0x468] sm:$0xff]  ;;  %v370_v21 = vld [vmem:[%s1230_s6 + $0x510] sm:$0xff] }
  0x64   : > { %v559_v52 = vadd.f32 %v558_v38, %v316_v27  ;;  %875 = vmatmul.f32.vlgmr.msra.gmra.mxu2 %v815_v46  ;;  %v410_v55 = vadd.f32 %v409_v42, %v408_v28  ;;  %v522_v56 = vadd.f32 %v521_v43, %v298_v33  ;;  %v597_v57 = vadd.f32 %v596_v44, %v337_v34  ;;  %v215_v26 = vld [vmem:[%s1230_s6 + $0x38] sm:$0xff]  ;;  %v373_v32 = vld [vmem:[%s1230_s6 + $0x528] sm:$0xff]  ;;  %v218_v37 = vld [vmem:[%s1230_s6 + $0x50] sm:$0xff] }
  0x65   : > { %v635_v58 = vadd.f32 %v634_v45, %v358_v35  ;;  %v447_v61 = vadd.f32 %v446_v50, %v445_v36  ;;  %v485_v62 = vrot.slane %v484_v51, 4  ;;  %v673_v0 = vadd.f32 %v379_v41, %v376_v40  ;;  %v391_v27 = vld [vmem:[%s1230_s6 + $0x5b8] sm:$0xff]  ;;  %v394_v38 = vld [vmem:[%s1230_s6 + $0x5d0] sm:$0xff] }
  0x66   : > { %v560_v63 = vadd.f32 %v559_v52, %v319_v39  ;;  %v411_v4 = vrot.slane %v410_v55, 1  ;;  %v523_v5 = vadd.f32 %v522_v56, %v301_v47  ;;  %v598_v6 = vadd.f32 %v597_v57, %v340_v48  ;;  %v221_v47 = vld [vmem:[%s1230_s6 + $0x68] sm:$0xff] }
  0x67   : > { %v636_v7 = vadd.f32 %v635_v58, %v361_v49  ;;  %v448_v9 = vrot.slane %v447_v61, 2  ;;  %v486_v10 = vadd.f32 %v485_v62, %v484_v51  ;;  %v674_v12 = vadd.f32 %v673_v0, %v382_v54  ;;  %v397_v48 = vld [vmem:[%s1230_s6 + $0x5e8] sm:$0xff] }
  0x68   : > { %v561_v11 = vadd.f32 %v560_v63, %v322_v53  ;;  %v412_v16 = vadd.f32 %v411_v4, %v410_v55  ;;  %v524_v17 = vrot.slane %v523_v5, 4  ;;  %v599_v18 = vadd.f32 %v598_v6, %v343_v59  ;;  %v233_v52 = vld [vmem:[%s1230_s6 + $0xc8] sm:$0xff]  ;;  %v236_v53 = vld [vmem:[%s1230_s6 + $0xe0] sm:$0xff]  ;;  %v239_v63 = vld [vmem:[%s1230_s6 + $0xf8] sm:$0xff] }
  0x69   : > { %v637_v19 = vadd.f32 %v636_v7, %v364_v60  ;;  %v449_v22 = vadd.f32 %v448_v9, %v447_v61  ;;  %v487_v23 = vrot.slane %v486_v10, 2  ;;  %v675_v25 = vadd.f32 %v674_v12, %v385_v3  ;;  %v224_v59 = vld [vmem:[%s1230_s6 + $0x80] sm:$0xff]  ;;  %v257_v0 = vld [vmem:[%s1230_s6 + $0x188] sm:$0xff]  ;;  %v227_v6 = vld [vmem:[%s1230_s6 + $0x98] sm:$0xff] }
  0x6a   : > { %v562_v24 = vadd.f32 %v561_v11, %v325_v1  ;;  %v525_v28 = vadd.f32 %v524_v17, %v523_v5  ;;  %v600_v29 = vadd.f32 %v599_v18, %v346_v2  ;;  %v413_v31 = vadd.f32 %v212_v14, %v209_v13  ;;  %v260_v1 = vld [vmem:[%s1230_s6 + $0x1a0] sm:$0xff]  ;;  %v242_v11 = vld [vmem:[%s1230_s6 + $0x110] sm:$0xff]  ;;  %v263_v12 = vld [vmem:[%s1230_s6 + $0x1b8] sm:$0xff] }
  0x6b   : > { %v638_v30 = vadd.f32 %v637_v19, %v367_v8  ;;  %v450_v33 = vrot.slane %v449_v22, 1  ;;  %v488_v34 = vadd.f32 %v487_v23, %v486_v10  ;;  %v676_v36 = vadd.f32 %v675_v25, %v388_v15  ;;  %v281_v17 = vld [vmem:[%s1230_s6 + $0x248] sm:$0xff]  ;;  %v284_v18 = vld [vmem:[%s1230_s6 + $0x260] sm:$0xff]  ;;  %v266_v25 = vld [vmem:[%s1230_s6 + $0x1d0] sm:$0xff] }
  0x6c   : > { %v563_v35 = vrot.slane %v562_v24, 4  ;;  %v526_v39 = vrot.slane %v525_v28, 2  ;;  %v601_v40 = vadd.f32 %v600_v29, %v349_v20  ;;  %v414_v42 = vadd.f32 %v413_v31, %v215_v26  ;;  %v248_v29 = vld [vmem:[%s1230_s6 + $0x140] sm:$0xff]  ;;  %v287_v31 = vld [vmem:[%s1230_s6 + $0x278] sm:$0xff] }
  0x6d   : > { %v639_v41 = vadd.f32 %v638_v30, %v370_v21  ;;  %v451_v43 = vadd.f32 %v450_v33, %v449_v22  ;;  %v489_v44 = vrot.slane %v488_v34, 1  ;;  %v677_v46 = vadd.f32 %v676_v36, %v391_v27  ;;  %v269_v30 = vld [vmem:[%s1230_s6 + $0x1e8] sm:$0xff] }
  0x6e   : > { %v564_v45 = vadd.f32 %v563_v35, %v562_v24  ;;  %v527_v49 = vadd.f32 %v526_v39, %v525_v28  ;;  %v602_v50 = vrot.slane %v601_v40, 4  ;;  %v415_v54 = vadd.f32 %v414_v42, %v218_v37  ;;  %v245_v24 = vld [vmem:[%s1230_s6 + $0x128] sm:$0xff]  ;;  %v308_v37 = vld [vmem:[%s1230_s6 + $0x320] sm:$0xff]  ;;  %v251_v42 = vld [vmem:[%s1230_s6 + $0x158] sm:$0xff] }
  0x6f   : > { %v640_v51 = vadd.f32 %v639_v41, %v373_v32  ;;  %v490_v55 = vadd.f32 %v489_v44, %v488_v34  ;;  %v678_v57 = vadd.f32 %v677_v46, %v394_v38  ;;  %v789_v58 = vsel %vm788_vm0, %v451_v43, %v412_v16  ;;  %v230_v16 = vld [vmem:[%s1230_s6 + $0xb0] sm:$0xff]  ;;  %v305_v36 = vld [vmem:[%s1230_s6 + $0x308] sm:$0xff] }
  0x70   : > { %v565_v56 = vrot.slane %v564_v45, 2  ;;  %v528_v60 = vrot.slane %v527_v49, 1  ;;  %v603_v61 = vadd.f32 %v602_v50, %v601_v40  ;;  %v416_v2 = vadd.f32 %v415_v54, %v221_v47  ;;  %v290_v43 = vld [vmem:[%s1230_s6 + $0x290] sm:$0xff]  ;;  %v311_v50 = vld [vmem:[%s1230_s6 + $0x338] sm:$0xff]  ;;  %v293_v54 = vld [vmem:[%s1230_s6 + $0x2a8] sm:$0xff] }
  0x71   : > { %v641_v62 = vrot.slane %v640_v51, 4  ;;  %v679_v4 = vadd.f32 %v678_v57, %v397_v48  ;;  %v791_v5 = vsel %vm790_vm1, %v490_v55, %v789_v58  ;;  %v452_v7 = vadd.f32 %v236_v53, %v233_v52  ;;  %v254_v48 = vld [vmem:[%s1230_s6 + $0x170] sm:$0xff]  ;;  %v329_v55 = vld [vmem:[%s1230_s6 + $0x3c8] sm:$0xff] }
  0x72   : > { %v566_v3 = vadd.f32 %v565_v56, %v564_v45  ;;  %v529_v8 = vadd.f32 %v528_v60, %v527_v49  ;;  %v604_v9 = vrot.slane %v603_v61, 2  ;;  %v417_v13 = vadd.f32 %v416_v2, %v224_v59  ;;  %v272_v49 = vld [vmem:[%s1230_s6 + $0x200] sm:$0xff] }
  0x73   : > { %v642_v10 = vadd.f32 %v641_v62, %v640_v51  ;;  %v680_v15 = vrot.slane %v679_v4, 4  ;;  %v453_v19 = vadd.f32 %v452_v7, %v239_v63  ;;  %v491_v20 = vadd.f32 %v260_v1, %v257_v0  ;;  %v332_v56 = vld [vmem:[%s1230_s6 + $0x3e0] sm:$0xff]  ;;  %v275_v62 = vld [vmem:[%s1230_s6 + $0x218] sm:$0xff]  ;;  %v314_v0 = vld [vmem:[%s1230_s6 + $0x350] sm:$0xff] }
  0x74   : > { %v567_v14 = vrot.slane %v566_v3, 1  ;;  %v605_v21 = vadd.f32 %v604_v9, %v603_v61  ;;  %v793_v23 = vsel %vm792_vm2, %v529_v8, %v791_v5  ;;  %v418_v26 = vadd.f32 %v417_v13, %v227_v6  ;;  %v296_v63 = vld [vmem:[%s1230_s6 + $0x2c0] sm:$0xff]  ;;  %v353_v5 = vld [vmem:[%s1230_s6 + $0x488] sm:$0xff] }
  0x75   : > { %v643_v22 = vrot.slane %v642_v10, 2  ;;  %v681_v28 = vadd.f32 %v680_v15, %v679_v4  ;;  %v454_v32 = vadd.f32 %v453_v19, %v242_v11  ;;  %v492_v33 = vadd.f32 %v491_v20, %v263_v12  ;;  %v335_v4 = vld [vmem:[%s1230_s6 + $0x3f8] sm:$0xff]  ;;  %v356_v6 = vld [vmem:[%s1230_s6 + $0x4a0] sm:$0xff]  ;;  %v278_v11 = vld [vmem:[%s1230_s6 + $0x230] sm:$0xff] }
  0x76   : > { %v568_v27 = vadd.f32 %v567_v14, %v566_v3  ;;  %v606_v34 = vrot.slane %v605_v21, 1  ;;  %v419_v38 = vadd.f32 %v418_v26, %v230_v16  ;;  %v530_v39 = vadd.f32 %v284_v18, %v281_v17  ;;  %v317_v12 = vld [vmem:[%s1230_s6 + $0x368] sm:$0xff]  ;;  %v299_v17 = vld [vmem:[%s1230_s6 + $0x2d8] sm:$0xff]  ;;  %v338_v18 = vld [vmem:[%s1230_s6 + $0x410] sm:$0xff] }
  0x77   : > { %v644_v35 = vadd.f32 %v643_v22, %v642_v10  ;;  %v682_v40 = vrot.slane %v681_v28, 2  ;;  %v455_v44 = vadd.f32 %v454_v32, %v245_v24  ;;  %v493_v45 = vadd.f32 %v492_v33, %v266_v25  ;;  %v359_v19 = vld [vmem:[%s1230_s6 + $0x4b8] sm:$0xff]  ;;  %v377_v24 = vld [vmem:[%s1230_s6 + $0x548] sm:$0xff]  ;;  %v380_v25 = vld [vmem:[%s1230_s6 + $0x560] sm:$0xff] }
  0x78   : > { %v795_v41 = vsel %vm794_vm3, %v568_v27, %v793_v23  ;;  %v607_v46 = vadd.f32 %v606_v34, %v605_v21  ;;  %v420_v51 = vrot.slane %v419_v38, 4  ;;  %v531_v52 = vadd.f32 %v530_v39, %v287_v31  ;;  %v320_v23 = vld [vmem:[%s1230_s6 + $0x380] sm:$0xff]  ;;  %v302_v31 = vld [vmem:[%s1230_s6 + $0x2f0] sm:$0xff]  ;;  %v341_v32 = vld [vmem:[%s1230_s6 + $0x428] sm:$0xff] }
  0x79   : > { %v645_v47 = vrot.slane %v644_v35, 1  ;;  %v683_v53 = vadd.f32 %v682_v40, %v681_v28  ;;  %v456_v57 = vadd.f32 %v455_v44, %v248_v29  ;;  %v494_v58 = vadd.f32 %v493_v45, %v269_v30  ;;  %v362_v33 = vld [vmem:[%s1230_s6 + $0x4d0] sm:$0xff] }
  0x7a   : > { %v569_v59 = vadd.f32 %v308_v37, %v305_v36  ;;  %v797_v61 = vsel %vm796_vm4, %v607_v46, %v795_v41  ;;  %v421_v1 = vadd.f32 %v420_v51, %v419_v38  ;;  %v532_v2 = vadd.f32 %v531_v52, %v290_v43  ;;  %v323_v37 = vld [vmem:[%s1230_s6 + $0x398] sm:$0xff]  ;;  %v365_v43 = vld [vmem:[%s1230_s6 + $0x4e8] sm:$0xff] }
  0x7b   : > { %v646_v60 = vadd.f32 %v645_v47, %v644_v35  ;;  %v684_v3 = vrot.slane %v683_v53, 1  ;;  %v457_v7 = vadd.f32 %v456_v57, %v251_v42  ;;  %v495_v8 = vadd.f32 %v494_v58, %v272_v49  ;;  %v383_v38 = vld [vmem:[%s1230_s6 + $0x578] sm:$0xff]  ;;  %v344_v42 = vld [vmem:[%s1230_s6 + $0x440] sm:$0xff]  ;;  %v386_v49 = vld [vmem:[%s1230_s6 + $0x590] sm:$0xff] }
  0x7c   : > { %v570_v9 = vadd.f32 %v569_v59, %v311_v50  ;;  %v422_v13 = vrot.slane %v421_v1, 2  ;;  %v533_v14 = vadd.f32 %v532_v2, %v293_v54  ;;  %v608_v15 = vadd.f32 %v332_v56, %v329_v55  ;;  %v347_v54 = vld [vmem:[%s1230_s6 + $0x458] sm:$0xff]  ;;  %v368_v55 = vld [vmem:[%s1230_s6 + $0x500] sm:$0xff] }
  0x7d   : > { %v799_v10 = vsel %vm798_vm5, %v646_v60, %v797_v61  ;;  %v685_v16 = vadd.f32 %v684_v3, %v683_v53  ;;  %v458_v20 = vadd.f32 %v457_v7, %v254_v48  ;;  %v496_v21 = vadd.f32 %v495_v8, %v275_v62  ;;  %v326_v48 = vld [vmem:[%s1230_s6 + $0x3b0] sm:$0xff]  ;;  %v389_v60 = vld [vmem:[%s1230_s6 + $0x5a8] sm:$0xff] }
  0x7e   : > { %v571_v22 = vadd.f32 %v570_v9, %v314_v0  ;;  %v423_v26 = vadd.f32 %v422_v13, %v421_v1  ;;  %v534_v27 = vadd.f32 %v533_v14, %v296_v63  ;;  %v609_v28 = vadd.f32 %v608_v15, %v335_v4  ;;  %v350_v0 = vld [vmem:[%s1230_s6 + $0x470] sm:$0xff]  ;;  %v371_v1 = vld [vmem:[%s1230_s6 + $0x518] sm:$0xff] }
  0x7f   : > { %v647_v29 = vadd.f32 %v356_v6, %v353_v5  ;;  %v801_v30 = vsel %vm800_vm6, %v685_v16, %v799_v10  ;;  %v459_v34 = vrot.slane %v458_v20, 4  ;;  %v497_v35 = vadd.f32 %v496_v21, %v278_v11  ;;  %v392_v6 = vld [vmem:[%s1230_s6 + $0x5c0] sm:$0xff]  ;;  %v374_v11 = vld [vmem:[%s1230_s6 + $0x530] sm:$0xff]  ;;  %v395_v16 = vld [vmem:[%s1230_s6 + $0x5d8] sm:$0xff] }
  0x80   : > { %v572_v36 = vadd.f32 %v571_v22, %v317_v12  ;;  %835 = vmatmul.f32.vlgmr.msra.gmra.mxu0 %v801_v30  ;;  %v535_v39 = vadd.f32 %v534_v27, %v299_v17  ;;  %v610_v40 = vadd.f32 %v609_v28, %v338_v18  ;;  %v686_v47 = vadd.f32 %v380_v25, %v377_v24  ;;  %v398_v24 = vld [vmem:[%s1230_s6 + $0x5f0] sm:$0xff]  ;;  %s965_s6 = sshll.u32 %s1628_s16, 3 }
  0x81   : > { %v648_v41 = vadd.f32 %v647_v29, %v359_v19  ;;  %v460_v44 = vadd.f32 %v459_v34, %v458_v20  ;;  %v498_v45 = vrot.slane %v497_v35, 4  ;;  %v424_v50 = vrot.slane %v423_v26, 1  ;;  %s207_s25 = scalar_lea.vmem %s1618_s3, %s965_s6 }
  0x82   : > { %v573_v46 = vadd.f32 %v572_v36, %v320_v23  ;;  %v536_v51 = vadd.f32 %v535_v39, %v302_v31  ;;  %v611_v52 = vadd.f32 %v610_v40, %v341_v32  ;;  %v687_v59 = vadd.f32 %v686_v47, %v383_v38 }
  0x83   : > { %v649_v53 = vadd.f32 %v648_v41, %v362_v33  ;;  %v461_v56 = vrot.slane %v460_v44, 2  ;;  %v499_v57 = vadd.f32 %v498_v45, %v497_v35  ;;  %v425_v7 = vadd.f32 %v424_v50, %v423_v26 }
  0x84   : > { %v574_v58 = vadd.f32 %v573_v46, %v323_v37  ;;  %v537_v61 = vrot.slane %v536_v51, 4  ;;  %v612_v62 = vadd.f32 %v611_v52, %v344_v42  ;;  %v688_v5 = vadd.f32 %v687_v59, %v386_v49 }
  0x85   : > { %v650_v63 = vadd.f32 %v649_v53, %v365_v43  ;;  %v462_v2 = vadd.f32 %v461_v56, %v460_v44  ;;  %v500_v3 = vrot.slane %v499_v57, 2 }
  0x86   : > { %v575_v4 = vadd.f32 %v574_v58, %v326_v48  ;;  %v538_v8 = vadd.f32 %v537_v61, %v536_v51  ;;  %v613_v9 = vadd.f32 %v612_v62, %v347_v54  ;;  %v689_v15 = vadd.f32 %v688_v5, %v389_v60  ;;  %v1023_v61 = vld [vmem:[#allocation4] ss:$0 sm:$0xff] }
  0x87   : > { %v651_v10 = vadd.f32 %v650_v63, %v368_v55  ;;  %v463_v12 = vrot.slane %v462_v2, 1  ;;  %v501_v13 = vadd.f32 %v500_v3, %v499_v57 }
  0x88   : > { %v576_v14 = vrot.slane %v575_v4, 4  ;;  %v539_v17 = vrot.slane %v538_v8, 2  ;;  %v614_v18 = vadd.f32 %v613_v9, %v350_v0  ;;  %v690_v23 = vadd.f32 %v689_v15, %v392_v6 }
  0x89   : > { %v652_v19 = vadd.f32 %v651_v10, %v371_v1  ;;  %v464_v20 = vadd.f32 %v463_v12, %v462_v2  ;;  %v502_v21 = vrot.slane %v501_v13, 1 }
  0x8a   : > { %v577_v22 = vadd.f32 %v576_v14, %v575_v4  ;;  %v540_v25 = vadd.f32 %v539_v17, %v538_v8  ;;  %v615_v26 = vrot.slane %v614_v18, 4  ;;  %v691_v30 = vadd.f32 %v690_v23, %v395_v16 }
  0x8b   : > { %v653_v27 = vadd.f32 %v652_v19, %v374_v11  ;;  %v503_v28 = vadd.f32 %v502_v21, %v501_v13  ;;  %v802_v31 = vsel %vm788_vm0, %v464_v20, %v425_v7 }
  0x8c   : > { %v578_v29 = vrot.slane %v577_v22, 2  ;;  %v541_v32 = vrot.slane %v540_v25, 1  ;;  %v616_v33 = vadd.f32 %v615_v26, %v614_v18  ;;  %v692_v36 = vadd.f32 %v691_v30, %v398_v24 }
  0x8d   : > { %v654_v34 = vrot.slane %v653_v27, 4  ;;  %v803_v37 = vsel %vm790_vm1, %v503_v28, %v802_v31 }
  0x8e   : > { %v579_v35 = vadd.f32 %v578_v29, %v577_v22  ;;  %v542_v38 = vadd.f32 %v541_v32, %v540_v25  ;;  %v617_v39 = vrot.slane %v616_v33, 2  ;;  %v693_v42 = vrot.slane %v692_v36, 4 }
  0x8f   : > { %v655_v40 = vadd.f32 %v654_v34, %v653_v27 }
  0x90   : > { %v580_v41 = vrot.slane %v579_v35, 1  ;;  %v618_v43 = vadd.f32 %v617_v39, %v616_v33  ;;  %v804_v45 = vsel %vm792_vm2, %v542_v38, %v803_v37  ;;  %v694_v47 = vadd.f32 %v693_v42, %v692_v36 }
  0x91   : > { %v656_v44 = vrot.slane %v655_v40, 2 }
  0x92   : > { %v581_v46 = vadd.f32 %v580_v41, %v579_v35  ;;  %v619_v48 = vrot.slane %v618_v43, 1  ;;  %v695_v50 = vrot.slane %v694_v47, 2 }
  0x93   : > { %v657_v49 = vadd.f32 %v656_v44, %v655_v40 }
  0x94   : > { %v805_v51 = vsel %vm794_vm3, %v581_v46, %v804_v45  ;;  %v620_v52 = vadd.f32 %v619_v48, %v618_v43  ;;  %v696_v54 = vadd.f32 %v695_v50, %v694_v47 }
  0x95   : > { %v658_v53 = vrot.slane %v657_v49, 1 }
  0x96   : > { %v806_v56 = vsel %vm796_vm4, %v620_v52, %v805_v51  ;;  %v697_v57 = vrot.slane %v696_v54, 1 }
  0x97   : > { %v659_v55 = vadd.f32 %v658_v53, %v657_v49 }
  0x98   : > { %v698_v59 = vadd.f32 %v697_v57, %v696_v54 }
  0x99   : > { %v807_v58 = vsel %vm798_vm5, %v659_v55, %v806_v56 }
  0x9a   : > { %v808_v60 = vsel %vm800_vm6, %v698_v59, %v807_v58 }
  0x9b   : > { %855 = vmatmul.f32.vlgmr.msra.gmra.mxu1 %v808_v60 }
  0xe7   : > { %v876_v1 = vpop.f32.mrf.mxu2 }
  0xfd   : > { %v836_v62 = vpop.f32.mrf.mxu0 }
  0xfe   : > { %v837_v63 = vadd.f32 %v1023_v61, %v836_v62 }
 0x118   : > { %v856_v0 = vpop.f32.mrf.mxu1 }
 0x119   : > { %v857_v2 = vadd.f32 %v856_v0, %v837_v63 }
 0x11b   : > { %v877_v3 = vadd.f32 %v876_v1, %v857_v2 }
 0x11d   : > { %880 = vst.msk [vmem:[%s207_s25] sm:$0xff] %vm879_vm7, %v877_v3 }
 0x11e PF: > { %p14_p8 = scmp.ge.s32.totalorder %s1169_s17, 4   ;;  %s1623_s12 = smov %s1114_s13 }
 0x11f   : > { %s1624_s13 = smov %s1118_s14  ;;  %s1625_s14 = smov %s1179_s20 }
 0x120   : > { %s1626_s15 = smov %s1169_s17  ;;  %16 = sbr.rel (!%p14_p8) target bundleno = 4 (0x4), region = 76 }
 0x125   :  { %900 = vsyncpa [#allocation3], 1 }
 0x126   :  { %902 = vsyncpa [#allocation3 + $0x1], 1 }
 0x127   :  { %903 = vsyncpa [#allocation5], 1 }

</bundles_post_ra>
